<compile_context>
chip_gen: v6e
topology: v6e:2x2x1
jax: 0.10.0
libtpu: 0.0.40
codegen_flags: <defaults>
</compile_context>

<pallas_src>
import functools

import jax
import jax.numpy as jnp
from jax import lax
from jax.experimental import pallas as pl
from jax.experimental.pallas import tpu as pltpu


def _pam_kernel(*refs, n_real, tq, fold_conv, bf16_exp):
    """Grid = (batch, query_tile).

    Scores are computed transposed (keys x queries) so the per-query softmax
    statistics land on the lane axis and the deferred normalizer is a cheap
    (1, tq) lane-broadcast multiply on the (C, tq) output block.
    """
    if fold_conv:
        patches_ref, w_ref, b_ref, bout_ref, out_ref, qkv_scr = refs
    else:
        (patches_ref, wconv_ref, bconv_ref, w_ref, b_ref, bout_ref,
         out_ref, qkv_scr) = refs

    C = bout_ref.shape[0]
    n_pad = qkv_scr.shape[-1]
    qi = pl.program_id(1)

    # ---- once per batch: project the whole image into the resident q/k/v scratch
    @pl.when(qi == 0)
    def _():
        patches = patches_ref[0]                               # (9C, n_pad) bf16
        if fold_conv:
            # conv folded into the projection: single (3C,9C)@(9C,N) K=288 matmul
            qkv = jnp.dot(w_ref[...], patches,
                          preferred_element_type=jnp.float32) + b_ref[...]
        else:
            y = jnp.dot(wconv_ref[...], patches,
                        preferred_element_type=jnp.float32) + bconv_ref[...]
            qkv = jnp.dot(w_ref[...], y.astype(jnp.bfloat16),
                          preferred_element_type=jnp.float32) + b_ref[...]
        qkv_scr[...] = qkv.astype(jnp.bfloat16)                # (3C, n_pad)

    # ---- per query tile ----
    qstart = pl.multiple_of(qi * tq, 128)
    q_blk = qkv_scr[0:C, pl.ds(qstart, tq)]                    # (C, tq)     bf16
    k_all = qkv_scr[C:2 * C, :]                                # (C, n_pad)  bf16
    v_all = qkv_scr[2 * C:3 * C, :]                            # (C, n_pad)  bf16

    # scores (keys, queries): contract over channels (dim 0 x dim 0).
    s = lax.dot_general(k_all, q_blk, (((0,), (0,)), ((), ())),
                        preferred_element_type=jnp.float32)    # (n_pad, tq) f32
    if n_real < n_pad:                                         # mask padded keys
        key_idx = lax.broadcasted_iota(jnp.int32, s.shape, 0)
        s = jnp.where(key_idx < n_real, s, -jnp.inf)

    m = jnp.max(s, axis=0, keepdims=True)                      # (1, tq) f32
    if bf16_exp:                                               # v6e/v7x: bf16 EUP
        p = jnp.exp((s - m).astype(jnp.bfloat16))              # (n_pad, tq) bf16
        l = jnp.sum(p, axis=0, keepdims=True, dtype=jnp.float32)
    else:                                                      # v5e/older: f32 exp
        p32 = jnp.exp(s - m)
        l = jnp.sum(p32, axis=0, keepdims=True)
        p = p32.astype(jnp.bfloat16)

    # unnormalized attention-weighted values (plain NN matmul), then deferred
    # softmax normalization as a (1, tq) lane-broadcast scale of the output.
    av = lax.dot_general(v_all, p, (((1,), (0,)), ((), ())),
                         preferred_element_type=jnp.float32)   # (C, tq) f32
    inv_l = pl.reciprocal(l, approx=True)                      # EUP slot
    out_ref[0] = (av * inv_l + bout_ref[...]).astype(out_ref.dtype)


def position_attention_module(x, params, *, tq=None, fold_conv=None, bf16_exp=None):
    """x: (bs, C, H, W) float32 NCHW. Returns (bs, H*W, C) (eval-mode forward)."""
    wc, bc, wq, bq, wk, bk, wv, bv, wo, bo = params
    bs, C, H, W = x.shape
    n_real = H * W
    assert C % 16 == 0, "d_model must be a multiple of 16 (bf16 sublane tile)"
    n_pad = ((n_real + 127) // 128) * 128          # lane-dense key/query axis

    if fold_conv is None:
        fold_conv = C <= 128          # fold conv into q/k/v weights only at small C
    if bf16_exp is None:
        kind = jax.devices()[0].device_kind.lower()
        bf16_exp = ("v6" in kind) or ("v7" in kind) or ("7x" in kind)
    if tq is None:
        tq = next(t for t in (512, 256, 128) if n_pad % t == 0)
    assert n_pad % tq == 0 and tq % 128 == 0

    # ---- trace-time weight folding (constants, not activations) ----
    scale = float(C) ** -0.5                       # 1/sqrt(d_k), d_k = d_model = C
    wq_s, bq_s = wq * scale, bq * scale            # fold score scale into Wq / bq
    wov = wo @ wv                                  # fold output projection into Wv
    b_out = (wo @ bv + bo).reshape(C, 1)           # re-added after normalization
    w_qkv = jnp.concatenate([wq_s, wk, wov], axis=0)                       # (3C, C)
    b_qkv = jnp.concatenate([bq_s, bk, jnp.zeros((C,), jnp.float32)], 0)   # (3C,)

    # ---- im2col patches, tap-major (t*C + c_in), lane axis padded to 128k ----
    xp = jnp.pad(x, ((0, 0), (0, 0), (1, 1), (1, 1)))
    taps = [xp[:, :, ki:ki + H, kj:kj + W].reshape(bs, C, n_real)
            for ki in range(3) for kj in range(3)]
    patches = jnp.concatenate(taps, axis=1)                                # (bs,9C,N)
    if n_pad != n_real:
        patches = jnp.pad(patches, ((0, 0), (0, 0), (0, n_pad - n_real)))
    patches = patches.astype(jnp.bfloat16)
    wconv_flat = jnp.transpose(wc, (0, 2, 3, 1)).reshape(C, 9 * C)

    if fold_conv:
        w_all = (w_qkv @ wconv_flat).astype(jnp.bfloat16)                  # (3C, 9C)
        b_all = (w_qkv @ bc + b_qkv).reshape(3 * C, 1)
        weight_args = (w_all, b_all)
        weight_shapes = [(3 * C, 9 * C), (3 * C, 1)]
    else:
        weight_args = (wconv_flat.astype(jnp.bfloat16), bc.reshape(C, 1),
                       w_qkv.astype(jnp.bfloat16), b_qkv.reshape(3 * C, 1))
        weight_shapes = [(C, 9 * C), (C, 1), (3 * C, C), (3 * C, 1)]

    def _const_spec(shape):
        return pl.BlockSpec(shape, lambda b, q: (0,) * len(shape))

    # generation-aware scoped-VMEM limit (v7x: 64 MiB phys, v5e/v6e: 128 MiB).
    try:
        cap = pltpu.get_tpu_info().vmem_capacity_bytes
        vmem_limit = max(32 * 1024 * 1024,
                         min(int(cap * 3 // 4), 112 * 1024 * 1024))
    except Exception:
        vmem_limit = 32 * 1024 * 1024

    grid_spec = pltpu.PrefetchScalarGridSpec(
        num_scalar_prefetch=0,
        grid=(bs, n_pad // tq),
        in_specs=[pl.BlockSpec((1, 9 * C, n_pad), lambda b, q: (b, 0, 0))]
                 + [_const_spec(s) for s in weight_shapes]
                 + [_const_spec((C, 1))],
        out_specs=pl.BlockSpec((1, C, tq), lambda b, q: (b, 0, q)),
        scratch_shapes=[pltpu.VMEM((3 * C, n_pad), jnp.bfloat16)],
    )

    out_cn = pl.pallas_call(
        functools.partial(_pam_kernel, n_real=n_real, tq=tq,
                          fold_conv=fold_conv, bf16_exp=bf16_exp),
        out_shape=jax.ShapeDtypeStruct((bs, C, n_pad), x.dtype),
        grid_spec=grid_spec,
        compiler_params=pltpu.CompilerParams(
            dimension_semantics=("parallel", "arbitrary"),
            vmem_limit_bytes=vmem_limit),
    )(patches, *weight_args, b_out)

    # layout plumbing back to the module's (bs, N, C) output
    return jnp.transpose(out_cn, (0, 2, 1))[:, :n_real, :]


def _reference(x, params):
    """Pure-JAX f32 reference matching the PyTorch module (eval mode)."""
    wc, bc, wq, bq, wk, bk, wv, bv, wo, bo = params
    bs, C, H, W = x.shape
    y = lax.conv_general_dilated(
        x, wc, window_strides=(1, 1), padding="SAME",
        dimension_numbers=("NCHW", "OIHW", "NCHW")) + bc.reshape(1, C, 1, 1)
    y = y.reshape(bs, C, H * W).transpose(0, 2, 1)             # (bs, N, C)
    q = y @ wq.T + bq
    k = y @ wk.T + bk
    v = y @ wv.T + bv
    att = jax.nn.softmax(q @ k.transpose(0, 2, 1) / jnp.sqrt(jnp.float32(C)), axis=-1)
    o = att @ v
    return o @ wo.T + bo


def _init_params(key, C):
    ks = jax.random.split(key, 10)
    s_conv = 1.0 / (C * 9) ** 0.5
    s_lin = 1.0 / C ** 0.5
    wc = jax.random.uniform(ks[0], (C, C, 3, 3), jnp.float32, -s_conv, s_conv)
    bc = jax.random.uniform(ks[1], (C,), jnp.float32, -s_conv, s_conv)
    wq = jax.random.uniform(ks[2], (C, C), jnp.float32, -s_lin, s_lin)
    bq = jax.random.uniform(ks[3], (C,), jnp.float32, -s_lin, s_lin)
    wk = jax.random.uniform(ks[4], (C, C), jnp.float32, -s_lin, s_lin)
    bk = jax.random.uniform(ks[5], (C,), jnp.float32, -s_lin, s_lin)
    wv = jax.random.uniform(ks[6], (C, C), jnp.float32, -s_lin, s_lin)
    bv = jax.random.uniform(ks[7], (C,), jnp.float32, -s_lin, s_lin)
    wo = jax.random.uniform(ks[8], (C, C), jnp.float32, -s_lin, s_lin)
    bo = jax.random.uniform(ks[9], (C,), jnp.float32, -s_lin, s_lin)
    return (wc, bc, wq, bq, wk, bk, wv, bv, wo, bo)


if __name__ == "__main__":
    key = jax.random.PRNGKey(0)
    kx, kp, kx2 = jax.random.split(key, 3)

    bs, C = 2, 32
    params = _init_params(kp, C)

    # Case A: lane-aligned feature map (N = 256), folded conv, two query tiles.
    H, W = 16, 16
    x = jax.random.normal(kx, (bs, C, H, W), jnp.float32)
    run_a = jax.jit(functools.partial(position_attention_module,
                                      params=params, tq=128))
    out_a = jax.block_until_ready(run_a(x))
    ref_a = _reference(x, params)
    assert out_a.shape == (bs, H * W, C), out_a.shape
    err_a = float(jnp.max(jnp.abs(out_a - ref_a)))
    assert jnp.allclose(out_a, ref_a, atol=2e-2, rtol=2e-2), err_a

    # Case B: module-default 7x7 map (N = 49 -> padded/masked to 128) and the
    # unfused-conv (large d_model) code path.
    H2, W2 = 7, 7
    x2 = jax.random.normal(kx2, (bs, C, H2, W2), jnp.float32)
    run_b = jax.jit(functools.partial(position_attention_module,
                                      params=params, fold_conv=False))
    out_b = jax.block_until_ready(run_b(x2))
    ref_b = _reference(x2, params)
    assert out_b.shape == (bs, H2 * W2, C), out_b.shape
    err_b = float(jnp.max(jnp.abs(out_b - ref_b)))
    assert jnp.allclose(out_b, ref_b, atol=2e-2, rtol=2e-2), err_b

    print("KERNEL_OK")
</pallas_src>

<mosaic_0001>
module attributes {stable_mosaic.version = 11 : i64} {
  func.func @_pam_kernel(%arg0: i32, %arg1: i32, %arg2: memref<1x288x256xbf16, #tpu.memory_space<vmem>>, %arg3: memref<96x288xbf16, #tpu.memory_space<vmem>>, %arg4: memref<96x1xf32, #tpu.memory_space<vmem>>, %arg5: memref<32x1xf32, #tpu.memory_space<vmem>>, %arg6: memref<1x32x128xf32, #tpu.memory_space<vmem>>, %arg7: memref<96x256xbf16, #tpu.memory_space<vmem>>) attributes {dimension_semantics = [#tpu.dimension_semantics<parallel>, #tpu.dimension_semantics<arbitrary>], iteration_bounds = array<i64: 2, 2>, scalar_prefetch = 0 : i64, scratch_operands = 1 : i64, tpu.core_type = #tpu.core_type<tc>, window_params = [{transform_indices = @transform_0, window_bounds = array<i64: 1, 288, 256>}, {pipeline_mode = #tpu.pipeline_mode<synchronous>, transform_indices = @transform_1, window_bounds = array<i64: 96, 288>}, {pipeline_mode = #tpu.pipeline_mode<synchronous>, transform_indices = @transform_2, window_bounds = array<i64: 96, 1>}, {pipeline_mode = #tpu.pipeline_mode<synchronous>, transform_indices = @transform_3, window_bounds = array<i64: 32, 1>}, {transform_indices = @transform_4, window_bounds = array<i64: 1, 32, 128>}]} {
    %c0_i32 = arith.constant 0 : i32
    %0 = arith.cmpi eq, %arg1, %c0_i32 : i32
    %1 = arith.extui %0 : i1 to i32
    %c0_i32_0 = arith.constant 0 : i32
    %2 = arith.cmpi ne, %1, %c0_i32_0 : i32
    scf.if %2 {
      %c0_11 = arith.constant 0 : index
      %c0_12 = arith.constant 0 : index
      %c0_13 = arith.constant 0 : index
      %28 = vector.load %arg2[%c0_11, %c0_12, %c0_13] : memref<1x288x256xbf16, #tpu.memory_space<vmem>>, vector<1x288x256xbf16>
      %29 = vector.shape_cast %28 : vector<1x288x256xbf16> to vector<288x256xbf16>
      %c0_14 = arith.constant 0 : index
      %c0_15 = arith.constant 0 : index
      %30 = vector.load %arg3[%c0_14, %c0_15] : memref<96x288xbf16, #tpu.memory_space<vmem>>, vector<96x288xbf16>
      %cst_16 = arith.constant dense<0.000000e+00> : vector<96x256xf32>
      %31 = tpu.matmul %30, %29, %cst_16 {dimension_numbers = #tpu.dot_dimension_numbers<[1], [0], [0], [1], [0, 0, 1, 1], [], []>} : vector<96x288xbf16>, vector<288x256xbf16>, vector<96x256xf32> -> vector<96x256xf32>
      %c0_17 = arith.constant 0 : index
      %c0_18 = arith.constant 0 : index
      %32 = vector.load %arg4[%c0_17, %c0_18] : memref<96x1xf32, #tpu.memory_space<vmem>>, vector<96x1xf32>
      %33 = vector.broadcast %32 : vector<96x1xf32> to vector<96x256xf32>
      %34 = arith.addf %31, %33 : vector<96x256xf32>
      %35 = arith.truncf %34 : vector<96x256xf32> to vector<96x256xbf16>
      %c0_19 = arith.constant 0 : index
      %c0_20 = arith.constant 0 : index
      %36 = vector.load %arg7[%c0_19, %c0_20] : memref<96x256xbf16, #tpu.memory_space<vmem>>, vector<96x256xbf16>
      tpu.vector_store %arg7[%c0_19, %c0_20], %35 {strides = array<i32>} : memref<96x256xbf16, #tpu.memory_space<vmem>>, vector<96x256xbf16>,
    } else {
    }
    %c128_i32 = arith.constant 128 : i32
    %3 = arith.muli %arg1, %c128_i32 : i32
    %4 = tpu.assume_multiple %3, 128 : i32
    %c0 = arith.constant 0 : index
    %5 = arith.index_cast %4 : i32 to index
    %6 = vector.load %arg7[%c0, %5] : memref<96x256xbf16, #tpu.memory_space<vmem>>, vector<32x128xbf16>
    %c32 = arith.constant 32 : index
    %c0_1 = arith.constant 0 : index
    %7 = vector.load %arg7[%c32, %c0_1] : memref<96x256xbf16, #tpu.memory_space<vmem>>, vector<32x256xbf16>
    %c64 = arith.constant 64 : index
    %c0_2 = arith.constant 0 : index
    %8 = vector.load %arg7[%c64, %c0_2] : memref<96x256xbf16, #tpu.memory_space<vmem>>, vector<32x256xbf16>
    %cst = arith.constant dense<0.000000e+00> : vector<256x128xf32>
    %9 = tpu.matmul %7, %6, %cst {dimension_numbers = #tpu.dot_dimension_numbers<[0], [0], [1], [1], [0, 1, 1, 1], [], []>} : vector<32x256xbf16>, vector<32x128xbf16>, vector<256x128xf32> -> vector<256x128xf32>
    %cst_3 = arith.constant dense<0xFF800000> : vector<128xf32>
    %10 = vector.multi_reduction <maximumf>, %9, %cst_3 [0] : vector<256x128xf32> to vector<128xf32>
    %11 = vector.shape_cast %10 : vector<128xf32> to vector<1x128xf32>
    %12 = vector.broadcast %11 : vector<1x128xf32> to vector<256x128xf32>
    %13 = arith.subf %9, %12 : vector<256x128xf32>
    %14 = math.exp %13 : vector<256x128xf32>
    %cst_4 = arith.constant dense<0.000000e+00> : vector<128xf32>
    %15 = vector.multi_reduction <add>, %14, %cst_4 [0] : vector<256x128xf32> to vector<128xf32>
    %16 = vector.shape_cast %15 : vector<128xf32> to vector<1x128xf32>
    %17 = arith.truncf %14 : vector<256x128xf32> to vector<256x128xbf16>
    %cst_5 = arith.constant dense<0.000000e+00> : vector<32x128xf32>
    %18 = tpu.matmul %8, %17, %cst_5 {dimension_numbers = #tpu.dot_dimension_numbers<[1], [0], [0], [1], [0, 0, 1, 1], [], []>} : vector<32x256xbf16>, vector<256x128xbf16>, vector<32x128xf32> -> vector<32x128xf32>
    %19 = tpu.reciprocal %16 {approx = true} : vector<1x128xf32> -> vector<1x128xf32>
    %20 = vector.broadcast %19 : vector<1x128xf32> to vector<32x128xf32>
    %21 = arith.mulf %18, %20 : vector<32x128xf32>
    %c0_6 = arith.constant 0 : index
    %c0_7 = arith.constant 0 : index
    %22 = vector.load %arg5[%c0_6, %c0_7] : memref<32x1xf32, #tpu.memory_space<vmem>>, vector<32x1xf32>
    %23 = vector.broadcast %22 : vector<32x1xf32> to vector<32x128xf32>
    %24 = arith.addf %21, %23 : vector<32x128xf32>
    %c0_8 = arith.constant 0 : index
    %c0_9 = arith.constant 0 : index
    %c0_10 = arith.constant 0 : index
    %25 = vector.load %arg6[%c0_8, %c0_9, %c0_10] : memref<1x32x128xf32, #tpu.memory_space<vmem>>, vector<1x32x128xf32>
    %26 = vector.shape_cast %25 : vector<1x32x128xf32> to vector<32x128xf32>
    %27 = vector.shape_cast %24 : vector<32x128xf32> to vector<1x32x128xf32>
    tpu.vector_store %arg6[%c0_8, %c0_9, %c0_10], %27 {strides = array<i32>} : memref<1x32x128xf32, #tpu.memory_space<vmem>>, vector<1x32x128xf32>,
    return
  }
  func.func @transform_0(%arg0: i32, %arg1: i32) -> (i32, i32, i32) {
    %c0_i32 = arith.constant 0 : i32
    %c0_i32_0 = arith.constant 0 : i32
    %c0_i32_1 = arith.constant 0 : i32
    return %arg0, %c0_i32, %c0_i32_0 : i32, i32, i32
  }
  func.func @transform_1(%arg0: i32, %arg1: i32) -> (i32, i32) {
    %c0_i32 = arith.constant 0 : i32
    %c0_i32_0 = arith.constant 0 : i32
    %c0_i32_1 = arith.constant 0 : i32
    return %c0_i32, %c0_i32_0 : i32, i32
  }
  func.func @transform_2(%arg0: i32, %arg1: i32) -> (i32, i32) {
    %c0_i32 = arith.constant 0 : i32
    %c0_i32_0 = arith.constant 0 : i32
    %c0_i32_1 = arith.constant 0 : i32
    return %c0_i32, %c0_i32_0 : i32, i32
  }
  func.func @transform_3(%arg0: i32, %arg1: i32) -> (i32, i32) {
    %c0_i32 = arith.constant 0 : i32
    %c0_i32_0 = arith.constant 0 : i32
    %c0_i32_1 = arith.constant 0 : i32
    return %c0_i32, %c0_i32_0 : i32, i32
  }
  func.func @transform_4(%arg0: i32, %arg1: i32) -> (i32, i32, i32) {
    %c0_i32 = arith.constant 0 : i32
    %c0_i32_0 = arith.constant 0 : i32
    return %arg0, %c0_i32, %arg1 : i32, i32, i32
  }
}

</mosaic_0001>

<bundles_post_ra>
// kernel: position_attention_module.1
= control target key start
LH: loop header
LB: loop body
LE: loop exit
PB: predicated region body
PF: predicated region fallthrough
CT: control target
= control target key end

     0   :  { %9 = vsyncpa [#allocation4], 0  ;;  %s2703_s0 = inlined_call_operand.vmem [shape: bf16[2,288,256], index: 0, kind: input, shape index: {}]   ;;  %s2704_s1 = inlined_call_operand.vmem [shape: bf16[96,288], index: 1, kind: input, shape index: {}]   ;;  %s2705_s2 = inlined_call_operand.vmem [shape: f32[96,1], index: 2, kind: input, shape index: {}]   ;;  %s2706_s3 = inlined_call_operand.vmem [shape: f32[32,1], index: 3, kind: input, shape index: {}]   ;;  %s2707_s4 = inlined_call_operand.hbm [shape: f32[2,32,256], index: 4, kind: output, shape index: {}]  }
   0x1   :  { %11 = vsyncpa [#allocation4 + $0x1], 0  ;;  %s2152_s15 = smov 0   ;;  %s2154_s16 = smov 0  }
   0x2   :  { %s2156_s17 = smov 0   ;;  %s2158_s18 = smov 0  }
   0x3   :  { %s2160_s19 = smov 0   ;;  %s2162_s20 = smov 0  }
   0x4   :  { %s2164_s21 = smov 0   ;;  %s2166_s22 = smov 0  }
   0x5 LB: > { %s1581_s23 = sadd.s32 4294967295, %s2119_s22   ;;  %s1582_s24 = sadd.s32 4294967294, %s2119_s22   ;;  %s2119_s22 = sphi %s2166_s22, %s17_s22   ;;  %s2115_s21 = sphi %s2164_s21, %s2716_s21   ;;  %s2111_s20 = sphi %s2162_s20, %s2715_s20   ;;  %s2107_s19 = sphi %s2160_s19, %s2714_s19   ;;  %s2103_s18 = sphi %s2158_s18, %s2713_s18   ;;  %s2099_s17 = sphi %s2156_s17, %s2712_s17   ;;  %s2095_s16 = sphi %s2154_s16, %s2711_s16   ;;  %s2091_s15 = sphi %s2152_s15, %s2710_s15  }
   0x6   : > { %s26_s25 = sadd.s32 1, %s2111_s20  ;;  %s29_s26 = sadd.s32 1, %s2115_s21 }
   0x7   : > { %p27_p0 = scmp.ge.s32.totalorder %s26_s25, 2  ;;  %p137_p1 = scmp.ne.s32.totalorder %s2099_s17, %s2095_s16 }
   0x8   : > { %p138_p2 = scmp.eq.s32.totalorder %s1581_s23, 3  ;;  %p143_p5 = scmp.ne.s32.totalorder %s2095_s16, %s2091_s15 }
   0x9   : > { %s2718_s25 = smov (%p27_p0, %s26_s25), 0  ;;  %s2720_s26 = smov (!%p27_p0, %s29_s26), %s2115_s21 }
   0xa   : > { %s123_s27 = ssub.s32 %s2111_s20, %s2718_s25  ;;  %p2203_p3 = por %p138_p2, %p137_p1 }
   0xb   : > { %p31_p4 = scmp.ge.s32.totalorder %s2720_s26, 2  ;;  %p144_p6 = scmp.eq.s32.totalorder %s1582_s24, 3 }
   0xc   : > { %p1585_p7 = scmp.ge.s32.totalorder %s2119_s22, 1  ;;  %p179_p9 = scmp.lt.s32.totalorder %s2119_s22, 5 }
   0xd   : > { %s2722_s26 = smov (%p31_p4, %s2720_s26), 0  ;;  %p2212_p8 = por %p144_p6, %p143_p5 }
   0xe   : > { %s122_s30 = ssub.s32 %s2115_s21, %s2722_s26  ;;  %s127_s5 = sadd.s32 1, %s2099_s17 }
   0xf   : > { %s124_s6 = sor.u32 %s123_s27, %s122_s30  ;;  %p180_p10 = pnand %p1585_p7, %p179_p9 }
  0x10   : > { %p125_p11 = scmp.eq.s32.totalorder %s124_s6, 0  ;;  %s202_s8 = sand.u32 (!%p180_p10), 1, %s2095_s16  }
  0x11   : > { %183 = sbr.rel (%p180_p10) target bundleno = 1020 (0x3fc), region = 36  ;;  %p205_p12 = scmp.lt.s32.totalorder (!%p180_p10), %s2107_s19, 1 }
  0x12   : > { %s2221_s7 = scalar_select %p125_p11, %s2099_s17, %s127_s5  }
  0x13   : > { %s1586_s9 = sshll.u32 (!%p180_p10), %s202_s8, 5  ;;  %p1588_p13 = scmp.ne.s32.totalorder (!%p180_p10), %s2103_s18, 0 }
  0x14   : > { %s2233_s23 = scalar_lea.vmem (!%p180_p10), [#allocation3], %s1586_s9 }
  0x16   : > { %s206_s10 = scalar_select %p205_p12, %s2107_s19, 1 }
  0x17   : > { %214 = sbr.rel (%p1588_p13) target bundleno = 340 (0x154), region = 40 }
  0x18   : > { %s1788_s11 = smul.u32 288, %s206_s10 }
  0x1a   : > { %s2231_s14 = scalar_lea.vmem %s2703_s0, %s1788_s11 }
  0x1c   : > { %v1867_v0 = vld [vmem:[%s2231_s14 + $0x74] ss:$8 sps:$4 sm:$0xff]   ;;  %v1869_v1 = vld [vmem:[%s2231_s14 + $0x70] ss:$8 sps:$4 sm:$0xff]   ;;  %v2121_v2 = vmov 0   ;;  %vm617_vm0 = vcmask 261120  }
  0x1d   : > { %761 = vmatprep.mubr.bf16.mxu1 %v2121_v2  ;;  %1865 = vset.pattern.permute.xlu0 %v2121_v2  ;;  %v1870_v3 = vld [vmem:[%s2231_s14 + $0x64] ss:$8 sps:$4 sm:$0xff]   ;;  %v1872_v4 = vld [vmem:[%s2231_s14 + $0x60] ss:$8 sps:$4 sm:$0xff]   ;;  %v1873_v5 = vld [vmem:[%s2231_s14 + $0x54] ss:$8 sps:$4 sm:$0xff]  }
  0x1e   : > { %636 = vmatprep.subr.bf16.mxu0 %v1867_v0  ;;  %1866 = vset.pattern.permute.xlu1 %v2121_v2  ;;  %v1875_v6 = vld [vmem:[%s2231_s14 + $0x50] ss:$8 sps:$4 sm:$0xff]   ;;  %v1876_v7 = vld [vmem:[%s2231_s14 + $0x44] ss:$8 sps:$4 sm:$0xff]   ;;  %v1878_v8 = vld [vmem:[%s2231_s14 + $0x40] ss:$8 sps:$4 sm:$0xff]  }
  0x1f   : > { %637 = vmatpush1.bf16.msra.mxu0 %v1869_v1  ;;  %v1879_v9 = vld [vmem:[%s2231_s14 + $0x34] ss:$8 sps:$4 sm:$0xff]   ;;  %v1881_v10 = vld [vmem:[%s2231_s14 + $0x30] ss:$8 sps:$4 sm:$0xff]   ;;  %v1882_v11 = vld [vmem:[%s2231_s14 + $0x24] ss:$8 sps:$4 sm:$0xff]  }
  0x20   : > { %638 = vmatprep.subr.bf16.mxu0 %v1870_v3  ;;  %v1884_v12 = vld [vmem:[%s2231_s14 + $0x20] ss:$8 sps:$4 sm:$0xff]   ;;  %v1908_v13 = vld [vmem:[%s2231_s14 + $0x114] ss:$8 sps:$4 sm:$0xff]   ;;  %v1911_v14 = vld [vmem:[%s2231_s14 + $0x110] ss:$8 sps:$4 sm:$0xff]  }
  0x21   : > { %v1885_v15 = vld [vmem:[%s2231_s14 + $0x14] ss:$8 sps:$4 sm:$0xff]   ;;  %741 = vmatprep.subr.bf16.mxu1 %v1908_v13  ;;  %v1914_v16 = vld [vmem:[%s2231_s14 + $0x104] ss:$8 sps:$4 sm:$0xff]   ;;  %v1917_v17 = vld [vmem:[%s2231_s14 + $0x100] ss:$8 sps:$4 sm:$0xff]  }
  0x22   : > { %742 = vmatpush1.bf16.msra.mxu1 %v1911_v14  ;;  %v1887_v18 = vld [vmem:[%s2231_s14 + $0x10] ss:$8 sps:$4 sm:$0xff]   ;;  %v1888_v19 = vld [vmem:[%s2231_s14 + $0x4] ss:$8 sps:$4 sm:$0xff]   ;;  %v1920_v20 = vld [vmem:[%s2704_s1 + $0x8] ss:$12 sps:$4 sm:$0xff]  }
  0x23   : > { %639 = vmatpush1.bf16.msra.mxu0 %v1872_v4  ;;  %743 = vmatprep.subr.bf16.mxu1 %v1914_v16  ;;  %v1924_v21 = vld [vmem:[%s2704_s1 + $0x4] ss:$12 sps:$4 sm:$0xff]   ;;  %v1890_v22 = vld [vmem:[%s2231_s14] ss:$8 sps:$4 sm:$0xff]   ;;  %v1891_v23 = vld [vmem:[%s2231_s14 + $0xf4] ss:$8 sps:$4 sm:$0xff]  }
  0x24   : > { %640 = vmatprep.subr.bf16.mxu0 %v1873_v5  ;;  %668 = vmatprep.mubr.bf16.mxu0 %v1924_v21  ;;  %v1893_v24 = vld [vmem:[%s2231_s14 + $0xf0] ss:$8 sps:$4 sm:$0xff]   ;;  %v1894_v25 = vld [vmem:[%s2231_s14 + $0xe4] ss:$8 sps:$4 sm:$0xff]   ;;  %v1896_v27 = vld [vmem:[%s2231_s14 + $0xe0] ss:$8 sps:$4 sm:$0xff]  }
  0x25   : > { %v1925_v26 = vld [vmem:[%s2704_s1 + $0x20] ss:$12 sps:$4 sm:$0xff]   ;;  %v1897_v28 = vld [vmem:[%s2231_s14 + $0xd4] ss:$8 sps:$4 sm:$0xff]   ;;  %v1899_v31 = vld [vmem:[%s2231_s14 + $0xd0] ss:$8 sps:$4 sm:$0xff]  }
  0x26   : > { %744 = vmatpush1.bf16.msra.mxu1 %v1917_v17  ;;  %v275_v29 = vld [vmem:[%s2705_s2] sm:$0xff]  ;;  %v277_v30 = vld [vmem:[%s2705_s2 + $0x10] sm:$0xff]  ;;  %v276_v33 = vld [vmem:[%s2705_s2 + $0x8] sm:$0xff] }
  0x27   : > { %641 = vmatpush1.bf16.msra.mxu0 %v1875_v6  ;;  %289 = vperm.xlu0 %1865, %v275_v29   ;;  %v1900_v32 = vld [vmem:[%s2231_s14 + $0xc4] ss:$8 sps:$4 sm:$0xff]   ;;  %v278_v35 = vld [vmem:[%s2705_s2 + $0x18] sm:$0xff]  ;;  %v1902_v36 = vld [vmem:[%s2231_s14 + $0xc0] ss:$8 sps:$4 sm:$0xff]  }
  0x28   : > { %642 = vmatprep.subr.bf16.mxu0 %v1876_v7  ;;  %299 = vperm.xlu1 %1866, %v277_v30   ;;  %v1929_v34 = vld [vmem:[%s2704_s1 + $0x38] ss:$12 sps:$4 sm:$0xff]   ;;  %v1903_v37 = vld [vmem:[%s2231_s14 + $0xb4] ss:$8 sps:$4 sm:$0xff]   ;;  %v280_v39 = vld [vmem:[%s2705_s2 + $0x28] sm:$0xff] }
  0x29   : > { %1643 = vmatmul.mubr.msk.bf16.vlgmr.msra.gmra.mxu1 %vm617_vm0, %v1920_v20  ;;  %v279_v38 = vld [vmem:[%s2705_s2 + $0x20] sm:$0xff]  ;;  %v1905_v40 = vld [vmem:[%s2231_s14 + $0xb0] ss:$8 sps:$4 sm:$0xff]   ;;  %v1912_v46 = vld [vmem:[%s2231_s14 + $0x94] ss:$8 sps:$4 sm:$0xff]  }
  0x2a   : > { %771 = vmatprep.mubr.bf16.mxu1 %v2121_v2  ;;  %v1906_v41 = vld [vmem:[%s2231_s14 + $0xa4] ss:$8 sps:$4 sm:$0xff]   ;;  %v281_v42 = vld [vmem:[%s2705_s2 + $0x30] sm:$0xff]  ;;  %v282_v44 = vld [vmem:[%s2705_s2 + $0x38] sm:$0xff] }
  0x2b   : > { %643 = vmatpush1.bf16.msra.mxu0 %v1878_v8  ;;  %294 = vperm.xlu0 %1865, %v276_v33   ;;  %v1933_v43 = vld [vmem:[%s2704_s1 + $0x50] ss:$12 sps:$4 sm:$0xff]   ;;  %v1910_v45 = vld [vmem:[%s2231_s14 + $0xa0] ss:$8 sps:$4 sm:$0xff]   ;;  %v1918_v50 = vld [vmem:[%s2231_s14 + $0x84] ss:$8 sps:$4 sm:$0xff]  }
  0x2c   : > { %644 = vmatprep.subr.bf16.mxu0 %v1879_v9  ;;  %304 = vperm.xlu1 %1866, %v278_v35   ;;  %v283_v47 = vld [vmem:[%s2705_s2 + $0x40] sm:$0xff]  ;;  %v284_v48 = vld [vmem:[%s2705_s2 + $0x48] sm:$0xff]  ;;  %v1916_v49 = vld [vmem:[%s2231_s14 + $0x90] ss:$8 sps:$4 sm:$0xff]  }
  0x2d   : > { %v285_v51 = vld [vmem:[%s2705_s2 + $0x50] sm:$0xff]  ;;  %v286_v53 = vld [vmem:[%s2705_s2 + $0x58] sm:$0xff]  ;;  %v1921_v54 = vld [vmem:[%s2231_s14 + $0x80] ss:$8 sps:$4 sm:$0xff]  }
  0x2e   : > { %v1937_v52 = vld [vmem:[%s2704_s1 + $0x68] ss:$12 sps:$4 sm:$0xff]   ;;  %v1922_v55 = vld [vmem:[%s2704_s1] ss:$12 sps:$4 sm:$0xff]   ;;  %v1928_v58 = vld [vmem:[%s2704_s1 + $0x18] ss:$12 sps:$4 sm:$0xff]  }
  0x2f   : > { %645 = vmatpush1.bf16.msra.mxu0 %v1881_v10  ;;  %309 = vperm.xlu0 %1865, %v279_v38   ;;  %v1926_v56 = vld [vmem:[%s2704_s1 + $0x1c] ss:$12 sps:$4 sm:$0xff]   ;;  %v1941_v57 = vld [vmem:[%s2704_s1 + $0x80] ss:$12 sps:$4 sm:$0xff]   ;;  %v1938_v63 = vld [vmem:[%s2704_s1 + $0x64] ss:$12 sps:$4 sm:$0xff]  }
  0x30   : > { %646 = vmatprep.subr.bf16.mxu0 %v1882_v11  ;;  %314 = vperm.xlu1 %1866, %v280_v39   ;;  %v1930_v59 = vld [vmem:[%s2704_s1 + $0x34] ss:$12 sps:$4 sm:$0xff]   ;;  %v1932_v60 = vld [vmem:[%s2704_s1 + $0x30] ss:$12 sps:$4 sm:$0xff]   ;;  %v1934_v61 = vld [vmem:[%s2704_s1 + $0x4c] ss:$12 sps:$4 sm:$0xff]  }
  0x31   : > { %1644 = vmatmul.mubr.msk.bf16.gmra.mxu1 %vm617_vm0, %v1925_v26  ;;  %v1936_v62 = vld [vmem:[%s2704_s1 + $0x48] ss:$12 sps:$4 sm:$0xff]   ;;  %v1940_v0 = vld [vmem:[%s2704_s1 + $0x60] ss:$12 sps:$4 sm:$0xff]  }
  0x32   : > { %781 = vmatprep.mubr.bf16.mxu1 %v2121_v2  ;;  %v1942_v1 = vld [vmem:[%s2704_s1 + $0x7c] ss:$12 sps:$4 sm:$0xff]  }
  0x33   : > { %647 = vmatpush1.bf16.msra.mxu0 %v1884_v12  ;;  %319 = vperm.xlu0 %1865, %v281_v42  }
  0x34   : > { %648 = vmatprep.subr.bf16.mxu0 %v1885_v15  ;;  %324 = vperm.xlu1 %1866, %v282_v44  }
  0x37   : > { %649 = vmatpush1.bf16.msra.mxu0 %v1887_v18  ;;  %329 = vperm.xlu0 %1865, %v283_v47  }
  0x38   : > { %650 = vmatprep.subr.bf16.mxu0 %v1888_v19  ;;  %334 = vperm.xlu1 %1866, %v284_v48  }
  0x39   : > { %1645 = vmatmul.mubr.msk.bf16.gmra.mxu1 %vm617_vm0, %v1929_v34 }
  0x3a   : > { %791 = vmatprep.mubr.bf16.mxu1 %v2121_v2 }
  0x3b   : > { %651 = vmatpush1.bf16.msra.mxu0 %v1890_v22  ;;  %339 = vperm.xlu0 %1865, %v285_v51  }
  0x3c   : > { %652 = vmatprep.subr.bf16.mxu0 %v1891_v23  ;;  %344 = vperm.xlu1 %1866, %v286_v53  }
  0x3f   : > { %653 = vmatpush2.bf16.msra.mxu0 %v1893_v24 }
  0x40   : > { %654 = vmatprep.subr.bf16.mxu0 %v1894_v25 }
  0x41   : > { %1646 = vmatmul.mubr.msk.bf16.gmra.mxu1 %vm617_vm0, %v1933_v43 }
  0x42   : > { %801 = vmatprep.mubr.bf16.mxu1 %v2121_v2 }
  0x43   : > { %655 = vmatpush2.bf16.msra.mxu0 %v1896_v27 }
  0x44   : > { %656 = vmatprep.subr.bf16.mxu0 %v1897_v28 }
  0x47   : > { %657 = vmatpush2.bf16.msra.mxu0 %v1899_v31 }
  0x48   : > { %658 = vmatprep.subr.bf16.mxu0 %v1900_v32 }
  0x49   : > { %1647 = vmatmul.mubr.msk.bf16.gmra.mxu1 %vm617_vm0, %v1937_v52 }
  0x4a   : > { %811 = vmatprep.mubr.bf16.mxu1 %v2121_v2  ;;  %v1944_v2 = vld [vmem:[%s2704_s1 + $0x78] ss:$12 sps:$4 sm:$0xff]  }
  0x4b   : > { %659 = vmatpush2.bf16.msra.mxu0 %v1902_v36 }
  0x4c   : > { %660 = vmatprep.subr.bf16.mxu0 %v1903_v37 }
  0x4f   : > { %661 = vmatpush2.bf16.msra.mxu0 %v1905_v40 }
  0x50   : > { %662 = vmatprep.subr.bf16.mxu0 %v1906_v41 }
  0x51   : > { %1648 = vmatmul.mubr.msk.bf16.gmra.mxu1 %vm617_vm0, %v1941_v57 }
  0x53   : > { %663 = vmatpush2.bf16.msra.mxu0 %v1910_v45 }
  0x54   : > { %664 = vmatprep.subr.bf16.mxu0 %v1912_v46 }
  0x57   : > { %665 = vmatpush2.bf16.msra.mxu0 %v1916_v49 }
  0x58   : > { %666 = vmatprep.subr.bf16.mxu0 %v1918_v50 }
  0x5b   : > { %667 = vmatpush2.bf16.msra.mxu0 %v1921_v54 }
  0x5e   : > { %669 = vmatmul.mubr.bf16.vlgmr.msra.gmra.mxu0 %v1922_v55 }
  0x5f   : > { %678 = vmatprep.mubr.bf16.mxu0 %v1926_v56 }
  0x66   : > { %679 = vmatmul.mubr.bf16.gmra.mxu0 %v1928_v58 }
  0x67   : > { %688 = vmatprep.mubr.bf16.mxu0 %v1930_v59 }
  0x6e   : > { %689 = vmatmul.mubr.bf16.gmra.mxu0 %v1932_v60 }
  0x6f   : > { %698 = vmatprep.mubr.bf16.mxu0 %v1934_v61 }
  0x76   : > { %699 = vmatmul.mubr.bf16.gmra.mxu0 %v1936_v62 }
  0x77   : > { %708 = vmatprep.mubr.bf16.mxu0 %v1938_v63 }
  0x7e   : > { %709 = vmatmul.mubr.bf16.gmra.mxu0 %v1940_v0 }
  0x7f   : > { %718 = vmatprep.mubr.bf16.mxu0 %v1942_v1 }
  0x86   : > { %719 = vmatmul.mubr.bf16.gmra.mxu0 %v1944_v2 }
  0xa2   : > { %v290_v13 = vpop.permute.xlu0 %289 }
  0xa3   : > { %v300_v26 = vpop.permute.xlu1 %299 }
  0xa6   : > { %v295_v19 = vpop.permute.xlu0 %294 }
  0xa7   : > { %v305_v37 = vpop.permute.xlu1 %304 }
  0xaa   : > { %v310_v46 = vpop.permute.xlu0 %309 }
  0xab   : > { %v315_v54 = vpop.permute.xlu1 %314 }
  0xae   : > { %v320_v63 = vpop.permute.xlu0 %319 }
  0xe9   : > { %v763_v3 = vpop.f32.mrf.mxu1 }
  0xeb   : > { %v765_v4 = vpop.f32.mrf.mxu1 }
  0xed   : > { %v767_v5 = vpop.f32.mrf.mxu1 }
  0xef   : > { %v769_v6 = vpop.f32.mrf.mxu1 }
  0xf1   : > { %v773_v7 = vpop.f32.mrf.mxu1 }
  0xf3   : > { %v775_v8 = vpop.f32.mrf.mxu1 }
  0xf5   : > { %v777_v9 = vpop.f32.mrf.mxu1 }
  0xf7   : > { %v779_v10 = vpop.f32.mrf.mxu1 }
  0xf9   : > { %v783_v11 = vpop.f32.mrf.mxu1 }
  0xfb   : > { %v785_v12 = vpop.f32.mrf.mxu1 }
  0xfd   : > { %v787_v14 = vpop.f32.mrf.mxu1 }
  0xff   : > { %v789_v16 = vpop.f32.mrf.mxu1 }
 0x101   : > { %v793_v22 = vpop.f32.mrf.mxu1 }
 0x103   : > { %v795_v31 = vpop.f32.mrf.mxu1 }
 0x105   : > { %v797_v40 = vpop.f32.mrf.mxu1 }
 0x107   : > { %v799_v49 = vpop.f32.mrf.mxu1 }
 0x109   : > { %v803_v58 = vpop.f32.mrf.mxu1 }
 0x11e   : > { %v670_v15 = vpop.f32.mrf.mxu0 }
 0x11f   : > { %v671_v17 = vadd.f32 %v670_v15, %v290_v13 }
 0x120   : > { %v672_v18 = vpop.f32.mrf.mxu0 }
 0x121   : > { %v673_v20 = vadd.f32 %v672_v18, %v290_v13  ;;  %v764_v23 = vadd.f32 %v763_v3, %v671_v17  ;;  %v805_v3 = vpop.f32.mrf.mxu1 }
 0x122   : > { %v674_v21 = vpop.f32.mrf.mxu0 }
 0x123   : > { %v766_v24 = vadd.f32 %v765_v4, %v673_v20  ;;  %v675_v25 = vadd.f32 %v674_v21, %v295_v19  ;;  %v807_v15 = vpop.f32.mrf.mxu1 }
 0x124   : > { %v676_v27 = vpop.f32.mrf.mxu0 }
 0x125   : > { %v1694_v28 = vpack.c.bf16 %v766_v24, %v764_v23  ;;  %v677_v29 = vadd.f32 %v676_v27, %v295_v19  ;;  %v768_v32 = vadd.f32 %v767_v5, %v675_v25  ;;  %v330_v19 = vpop.permute.xlu0 %329  ;;  %v809_v24 = vpop.f32.mrf.mxu1 }
 0x126   : > { %v680_v30 = vpop.f32.mrf.mxu0 }
 0x127   : > { %894 = vst [vmem:[#allocation2] sm:$0xff] %v1694_v28  ;;  %v770_v33 = vadd.f32 %v769_v6, %v677_v29  ;;  %v681_v34 = vadd.f32 %v680_v30, %v300_v26 }
 0x128   : > { %v682_v35 = vpop.f32.mrf.mxu0 }
 0x129   : > { %v1695_v36 = vpack.c.bf16 %v770_v33, %v768_v32  ;;  %v683_v38 = vadd.f32 %v682_v35, %v300_v26  ;;  %v774_v41 = vadd.f32 %v773_v7, %v681_v34  ;;  %v813_v32 = vpop.f32.mrf.mxu1  ;;  %v340_v35 = vpop.permute.xlu0 %339 }
 0x12a   : > { %v684_v39 = vpop.f32.mrf.mxu0 }
 0x12b   : > { %895 = vst [vmem:[#allocation2 + $0x8] sm:$0xff] %v1695_v36  ;;  %v776_v42 = vadd.f32 %v775_v8, %v683_v38  ;;  %v685_v43 = vadd.f32 %v684_v39, %v305_v37  ;;  %v325_v8 = vpop.permute.xlu1 %324  ;;  %v815_v38 = vpop.f32.mrf.mxu1 }
 0x12c   : > { %v686_v44 = vpop.f32.mrf.mxu0 }
 0x12d   : > { %v1696_v45 = vpack.c.bf16 %v776_v42, %v774_v41  ;;  %v687_v47 = vadd.f32 %v686_v44, %v305_v37  ;;  %v778_v50 = vadd.f32 %v777_v9, %v685_v43 }
 0x12e   : > { %v690_v48 = vpop.f32.mrf.mxu0 }
 0x12f   : > { %896 = vst [vmem:[#allocation2 + $0x10] sm:$0xff] %v1696_v45  ;;  %v780_v51 = vadd.f32 %v779_v10, %v687_v47  ;;  %v691_v52 = vadd.f32 %v690_v48, %v310_v46  ;;  %v335_v27 = vpop.permute.xlu1 %334  ;;  %v817_v47 = vpop.f32.mrf.mxu1 }
 0x130   : > { %v692_v53 = vpop.f32.mrf.mxu0 }
 0x131   : > { %v1697_v55 = vpack.c.bf16 %v780_v51, %v778_v50  ;;  %v693_v56 = vadd.f32 %v692_v53, %v310_v46  ;;  %v784_v59 = vadd.f32 %v783_v11, %v691_v52 }
 0x132   : > { %v694_v57 = vpop.f32.mrf.mxu0 }
 0x133   : > { %897 = vst [vmem:[#allocation2 + $0x18] sm:$0xff] %v1697_v55  ;;  %v786_v60 = vadd.f32 %v785_v12, %v693_v56  ;;  %v695_v61 = vadd.f32 %v694_v57, %v315_v54  ;;  %v345_v44 = vpop.permute.xlu1 %344  ;;  %v819_v55 = vpop.f32.mrf.mxu1 }
 0x134   : > { %v696_v62 = vpop.f32.mrf.mxu0 }
 0x135   : > { %v1698_v0 = vpack.c.bf16 %v786_v60, %v784_v59  ;;  %v697_v1 = vadd.f32 %v696_v62, %v315_v54  ;;  %v788_v4 = vadd.f32 %v787_v14, %v695_v61 }
 0x136   : > { %v700_v2 = vpop.f32.mrf.mxu0 }
 0x137   : > { %898 = vst [vmem:[#allocation2 + $0x20] sm:$0xff] %v1698_v0  ;;  %v790_v5 = vadd.f32 %v789_v16, %v697_v1  ;;  %v701_v6 = vadd.f32 %v700_v2, %v320_v63 }
 0x138   : > { %v702_v7 = vpop.f32.mrf.mxu0 }
 0x139   : > { %v1699_v9 = vpack.c.bf16 %v790_v5, %v788_v4  ;;  %v703_v10 = vadd.f32 %v702_v7, %v320_v63  ;;  %v794_v11 = vadd.f32 %v793_v22, %v701_v6 }
 0x13a   : > { %v704_v13 = vpop.f32.mrf.mxu0 }
 0x13b   : > { %899 = vst [vmem:[#allocation2 + $0x28] sm:$0xff] %v1699_v9  ;;  %v796_v12 = vadd.f32 %v795_v31, %v703_v10  ;;  %v705_v17 = vadd.f32 %v704_v13, %v325_v8 }
 0x13c   : > { %v706_v18 = vpop.f32.mrf.mxu0 }
 0x13d   : > { %v1700_v20 = vpack.c.bf16 %v796_v12, %v794_v11  ;;  %v707_v21 = vadd.f32 %v706_v18, %v325_v8  ;;  %v798_v14 = vadd.f32 %v797_v40, %v705_v17 }
 0x13e   : > { %v710_v23 = vpop.f32.mrf.mxu0 }
 0x13f   : > { %900 = vst [vmem:[#allocation2 + $0x30] sm:$0xff] %v1700_v20  ;;  %v800_v16 = vadd.f32 %v799_v49, %v707_v21  ;;  %v711_v25 = vadd.f32 %v710_v23, %v330_v19 }
 0x140   : > { %v712_v26 = vpop.f32.mrf.mxu0 }
 0x141   : > { %v1701_v28 = vpack.c.bf16 %v800_v16, %v798_v14  ;;  %v713_v29 = vadd.f32 %v712_v26, %v330_v19  ;;  %v804_v22 = vadd.f32 %v803_v58, %v711_v25 }
 0x142   : > { %v714_v30 = vpop.f32.mrf.mxu0 }
 0x143   : > { %901 = vst [vmem:[#allocation2 + $0x38] sm:$0xff] %v1701_v28  ;;  %v806_v31 = vadd.f32 %v805_v3, %v713_v29  ;;  %v715_v33 = vadd.f32 %v714_v30, %v335_v27 }
 0x144   : > { %v716_v34 = vpop.f32.mrf.mxu0 }
 0x145   : > { %v1702_v36 = vpack.c.bf16 %v806_v31, %v804_v22  ;;  %v717_v37 = vadd.f32 %v716_v34, %v335_v27  ;;  %v808_v40 = vadd.f32 %v807_v15, %v715_v33 }
 0x146   : > { %v720_v39 = vpop.f32.mrf.mxu0 }
 0x147   : > { %902 = vst [vmem:[#allocation2 + $0x40] sm:$0xff] %v1702_v36  ;;  %v810_v41 = vadd.f32 %v809_v24, %v717_v37  ;;  %v721_v42 = vadd.f32 %v720_v39, %v340_v35 }
 0x148   : > { %v722_v43 = vpop.f32.mrf.mxu0 }
 0x149   : > { %v1703_v45 = vpack.c.bf16 %v810_v41, %v808_v40  ;;  %v723_v46 = vadd.f32 %v722_v43, %v340_v35  ;;  %v814_v49 = vadd.f32 %v813_v32, %v721_v42 }
 0x14a   : > { %v724_v48 = vpop.f32.mrf.mxu0 }
 0x14b   : > { %903 = vst [vmem:[#allocation2 + $0x48] sm:$0xff] %v1703_v45  ;;  %v816_v50 = vadd.f32 %v815_v38, %v723_v46  ;;  %v725_v51 = vadd.f32 %v724_v48, %v345_v44 }
 0x14c   : > { %v726_v52 = vpop.f32.mrf.mxu0 }
 0x14d   : > { %v1704_v53 = vpack.c.bf16 %v816_v50, %v814_v49  ;;  %v727_v54 = vadd.f32 %v726_v52, %v345_v44  ;;  %v818_v56 = vadd.f32 %v817_v47, %v725_v51 }
 0x14f   : > { %904 = vst [vmem:[#allocation2 + $0x50] sm:$0xff] %v1704_v53  ;;  %v820_v57 = vadd.f32 %v819_v55, %v727_v54 }
 0x151   : > { %v1705_v58 = vpack.c.bf16 %v820_v57, %v818_v56 }
 0x153   : > { %905 = vst [vmem:[#allocation2 + $0x58] sm:$0xff] %v1705_v58 }
 0x154 PF: > { %v1947_v59 = vld [vmem:[#allocation2 + $0x20] ss:$8 sps:$4 sm:$0xff]   ;;  %s1661_s12 = sshll.u32 %s2103_s18, 7  ;;  %v1949_v60 = vld [vmem:[#allocation2 + $0x30] ss:$8 sps:$4 sm:$0xff]   ;;  %vm987_vm1 = vcmask 261120  }
 0x155   : > { %s907_s13 = sshra.s32 %s1661_s12, 7  ;;  %943 = vxpose.xlu0.c.b16.start [1/2] (short) %v1947_v59, 128  ;;  %v1951_v61 = vld [vmem:[#allocation2 + $0x24] ss:$8 sps:$4 sm:$0xff]   ;;  %v1952_v62 = vld [vmem:[#allocation2 + $0x34] ss:$8 sps:$4 sm:$0xff]   ;;  %v2122_v56 = vmov 0  }
 0x156   : > { %s1662_s24 = sshll.u32 %s907_s13, 2  ;;  %959 = vxpose.xlu1.c.b16.start [1/2] (short) %v1951_v61, 128  ;;  %v1957_v37 = vld [vmem:[#allocation2 + $0x44] ss:$8 sps:$4 sm:$0xff]   ;;  %s1690_s13 = sshll.u32 %s2107_s19, 3 }
 0x157   : > { %s910_s27 = scalar_lea.vmem [#allocation2], %s1662_s24  ;;  %1435 = vmatprep.mubr.bf16.mxu1 %v1957_v37  ;;  %v1458_v51 = vld [vmem:[%s2706_s3 + $0x8] sm:$0xff]  ;;  %v1457_v52 = vld [vmem:[%s2706_s3] sm:$0xff]  ;;  %s1501_s24 = sadd.s32 %s2103_s18, %s1690_s13 }
 0x158   : > { %s1504_s14 = sshll.u32 %s2233_s23, 4  ;;  %s2652_s18 = scalar_lea.sflag [#allocation4], %s202_s8  ;;  %s2647_s14 = int_to_ptr.vmem [resolvable:$true] %s1504_s14 }
 0x159   : > { %944 = vxpose.xlu0.c.b16.end [2/2] (short) %v1949_v60, 128  ;;  %s2027_s6 = scalar_lea.vmem %s2647_s14, 512  ;;  %s2123_s9 = smov [#allocation3]  }
 0x15a   : > { %v1953_v63 = vld [vmem:[%s910_s27 + $0x10] ss:$8 sps:$4 sm:$0xff]   ;;  %v1954_v0 = vld [vmem:[%s910_s27] ss:$8 sps:$4 sm:$0xff]   ;;  %960 = vxpose.xlu1.c.b16.end [2/2] (short) %v1952_v62, 128  ;;  %s1691_s27 = sshll.u32 %s1501_s24, 7  ;;  %p2028_p0 = scmp.ne.s32.totalorder %s2647_s14, %s2027_s6 }
 0x15b   : > { %1752 = vmatprep.subr.bf16.mxu0 %v1953_v63  ;;  %v1459_v62 = vld [vmem:[%s2706_s3 + $0x10] sm:$0xff]  ;;  %s2645_s5 = scalar_lea.hbm %s2707_s4, %s1691_s27  ;;  %s2031_s10 = sshll.u32 %s2123_s9, 4  ;;  %s2032_s10 = int_to_ptr.vmem [resolvable:$false] %s2031_s10 }
 0x15c   : > { %1753 = vmatpush3.bf16.msra.mxu0 %v1953_v63  ;;  %p2029_p1 = pnand %p2028_p0, %p2203_p3  ;;  %s2033_s11 = scalar_lea.vmem %s2032_s10, 1024 }
 0x15d   : > { %1754 = vmatprep.subr.bf16.mxu0 %v1954_v0  ;;  %p2034_p4 = scmp.lt.s32.totalorder %s2647_s14, %s2032_s10  ;;  %p2035_p5 = scmp.lt.s32.totalorder %s2033_s11, %s2027_s6 }
 0x15e   : > { %1946 = vset.pattern.permute.xlu1 %v2122_v56  ;;  %p2030_p2 = pneg %p2029_p1 }
 0x15f   : > { %p2036_p6 = por %p2035_p5, %p2034_p4 }
 0x160   : > { %1755 = vmatpush3.bf16.msra.mxu0 %v1954_v0 }
 0x161   : > { %p2037_p7 = pnand %p2036_p6, %p2030_p2 }
 0x162   : > { %1945 = vset.pattern.permute.xlu0 %v2122_v56 }
 0x176   : > { %1468 = vperm.xlu1 %1946, %v1458_v51  }
 0x17a   : > { %1463 = vperm.xlu0 %1945, %v1457_v52   ;;  %1473 = vperm.xlu1 %1946, %v1459_v62  }
 0x1b7   : > { %v951_v1 = vpop.trf.xlu0 }
 0x1b8   : > { %1756 = vmatprep.mubr.msk.bf16.mxu0 %vm987_vm1, %v951_v1  ;;  %v967_v5 = vpop.trf.xlu1 }
 0x1bb   : > { %v952_v2 = vpop.trf.xlu0 }
 0x1bc   : > { %1757 = vmatmul.mubr.msk.bf16.vlgmr.msra.gmra.mxu0 %vm987_vm1, %v952_v2  ;;  %v968_v8 = vpop.trf.xlu1 }
 0x1bf   : > { %v953_v3 = vpop.trf.xlu0 }
 0x1c0   : > { %1760 = vmatprep.mubr.msk.bf16.mxu0 %vm987_vm1, %v953_v3  ;;  %v969_v10 = vpop.trf.xlu1 }
 0x1c3   : > { %v954_v4 = vpop.trf.xlu0 }
 0x1c4   : > { %1761 = vmatmul.mubr.msk.bf16.gmra.mxu0 %vm987_vm1, %v954_v4  ;;  %v970_v15 = vpop.trf.xlu1 }
 0x1c7   : > { %v955_v6 = vpop.trf.xlu0 }
 0x1c8   : > { %1764 = vmatprep.mubr.msk.bf16.mxu0 %vm987_vm1, %v955_v6  ;;  %v971_v11 = vpop.trf.xlu1 }
 0x1cb   : > { %v956_v7 = vpop.trf.xlu0 }
 0x1cc   : > { %1765 = vmatmul.mubr.msk.bf16.gmra.mxu0 %vm987_vm1, %v956_v7  ;;  %v972_v12 = vpop.trf.xlu1 }
 0x1cf   : > { %v957_v9 = vpop.trf.xlu0 }
 0x1d0   : > { %1768 = vmatprep.mubr.msk.bf16.mxu0 %vm987_vm1, %v957_v9  ;;  %v973_v17 = vpop.trf.xlu1  ;;  %v1460_v9 = vld [vmem:[%s2706_s3 + $0x18] sm:$0xff] }
 0x1d1   : > { %1478 = vperm.xlu1 %1946, %v1460_v9  }
 0x1d3   : > { %v958_v13 = vpop.trf.xlu0 }
 0x1d4   : > { %1769 = vmatmul.mubr.msk.bf16.gmra.mxu0 %vm987_vm1, %v958_v13  ;;  %v974_v18 = vpop.trf.xlu1 }
 0x1d5   : > { %1772 = vmatprep.mubr.msk.bf16.mxu0 %vm987_vm1, %v967_v5 }
 0x1dc   : > { %1773 = vmatmul.mubr.msk.bf16.gmra.mxu0 %vm987_vm1, %v968_v8 }
 0x1dd   : > { %1776 = vmatprep.mubr.msk.bf16.mxu0 %vm987_vm1, %v969_v10 }
 0x1e4   : > { %1777 = vmatmul.mubr.msk.bf16.gmra.mxu0 %vm987_vm1, %v970_v15 }
 0x1e5   : > { %1780 = vmatprep.mubr.msk.bf16.mxu0 %vm987_vm1, %v971_v11 }
 0x1ec   : > { %1781 = vmatmul.mubr.msk.bf16.gmra.mxu0 %vm987_vm1, %v972_v12 }
 0x1ed   : > { %1784 = vmatprep.mubr.msk.bf16.mxu0 %vm987_vm1, %v973_v17 }
 0x1f4   : > { %1785 = vmatmul.mubr.msk.bf16.gmra.mxu0 %vm987_vm1, %v974_v18 }
 0x27c   : > { %v2393_v19 = vpop.f32.mrf.mxu0 }
 0x27e   : > { %v2395_v20 = vpop.f32.mrf.mxu0 }
 0x280   : > { %v2397_v21 = vpop.f32.mrf.mxu0 }
 0x282   : > { %v2399_v23 = vpop.f32.mrf.mxu0 }
 0x284   : > { %v2401_v24 = vpop.f32.mrf.mxu0 }
 0x285   : > { %v1199_v44 = vmax.f32 %v2393_v19, %v2401_v24 }
 0x286   : > { %v2403_v14 = vpop.f32.mrf.mxu0 }
 0x287   : > { %v1197_v46 = vmax.f32 %v2395_v20, %v2403_v14 }
 0x288   : > { %v2405_v16 = vpop.f32.mrf.mxu0 }
 0x289   : > { %v1200_v43 = vmax.f32 %v2397_v21, %v2405_v16 }
 0x28a   : > { %v2407_v25 = vpop.f32.mrf.mxu0 }
 0x28b   : > { %v1198_v47 = vmax.f32 %v2399_v23, %v2407_v25 }
 0x28c   : > { %v2409_v26 = vpop.f32.mrf.mxu0 }
 0x28d   : > { %v1203_v49 = vmax.f32 %v1199_v44, %v2409_v26 }
 0x28e   : > { %v2411_v27 = vpop.f32.mrf.mxu0 }
 0x28f   : > { %v1201_v53 = vmax.f32 %v1197_v46, %v2411_v27 }
 0x290   : > { %v2413_v28 = vpop.f32.mrf.mxu0 }
 0x291   : > { %v1204_v48 = vmax.f32 %v1200_v43, %v2413_v28 }
 0x292   : > { %v2415_v29 = vpop.f32.mrf.mxu0 }
 0x293   : > { %v1202_v54 = vmax.f32 %v1198_v47, %v2415_v29 }
 0x294   : > { %v2417_v30 = vpop.f32.mrf.mxu0 }
 0x295   : > { %v1207_v58 = vmax.f32 %v1203_v49, %v2417_v30 }
 0x296   : > { %v2419_v32 = vpop.f32.mrf.mxu0 }
 0x297   : > { %v1205_v59 = vmax.f32 %v1201_v53, %v2419_v32 }
 0x298   : > { %v2421_v22 = vpop.f32.mrf.mxu0 }
 0x299   : > { %v1208_v55 = vmax.f32 %v1204_v48, %v2421_v22 }
 0x29a   : > { %v2423_v31 = vpop.f32.mrf.mxu0 }
 0x29b   : > { %v1206_v60 = vmax.f32 %v1202_v54, %v2423_v31 }
 0x29c   : > { %v2425_v33 = vpop.f32.mrf.mxu0 }
 0x29d   : > { %v1211_v0 = vmax.f32 %v1207_v58, %v2425_v33 }
 0x29e   : > { %v2427_v34 = vpop.f32.mrf.mxu0 }
 0x29f   : > { %v1209_v1 = vmax.f32 %v1205_v59, %v2427_v34 }
 0x2a0   : > { %v2429_v35 = vpop.f32.mrf.mxu0 }
 0x2a1   : > { %v1212_v61 = vmax.f32 %v1208_v55, %v2429_v35 }
 0x2a2   : > { %v2431_v36 = vpop.f32.mrf.mxu0 }
 0x2a3   : > { %v1210_v2 = vmax.f32 %v1206_v60, %v2431_v36 }
 0x2a4   : > { %v2433_v38 = vpop.f32.mrf.mxu0 }
 0x2a5   : > { %v1215_v5 = vmax.f32 %v1211_v0, %v2433_v38 }
 0x2a6   : > { %v2435_v39 = vpop.f32.mrf.mxu0 }
 0x2a7   : > { %v1213_v6 = vmax.f32 %v1209_v1, %v2435_v39 }
 0x2a8   : > { %v2437_v40 = vpop.f32.mrf.mxu0 }
 0x2a9   : > { %v1216_v3 = vmax.f32 %v1212_v61, %v2437_v40 }
 0x2aa   : > { %v2439_v41 = vpop.f32.mrf.mxu0 }
 0x2ab   : > { %v1214_v7 = vmax.f32 %v1210_v2, %v2439_v41 }
 0x2ac   : > { %v2441_v42 = vpop.f32.mrf.mxu0 }
 0x2ad   : > { %v1219_v13 = vmax.f32 %v1215_v5, %v2441_v42 }
 0x2ae   : > { %v2447_v45 = vpop.f32.mrf.mxu0 }
 0x2af   : > { %v1217_v15 = vmax.f32 %v1213_v6, %v2447_v45 }
 0x2b0   : > { %v2455_v50 = vpop.f32.mrf.mxu0 }
 0x2b1   : > { %v1220_v8 = vmax.f32 %v1216_v3, %v2455_v50 }
 0x2b2   : > { %v2466_v57 = vpop.f32.mrf.mxu0 }
 0x2b3   : > { %v1218_v11 = vmax.f32 %v1214_v7, %v2466_v57 }
 0x2b4   : > { %v2475_v63 = vpop.f32.mrf.mxu0 }
 0x2b5   : > { %v1223_v18 = vmax.f32 %v1219_v13, %v2475_v63 }
 0x2b6   : > { %v2481_v4 = vpop.f32.mrf.mxu0 }
 0x2b7   : > { %v1221_v37 = vmax.f32 %v1217_v15, %v2481_v4 }
 0x2b8   : > { %v2490_v10 = vpop.f32.mrf.mxu0 }
 0x2b9   : > { %v1224_v12 = vmax.f32 %v1220_v8, %v2490_v10 }
 0x2ba   : > { %v2496_v17 = vpop.f32.mrf.mxu0 }
 0x2bb   : > { %v1222_v43 = vmax.f32 %v1218_v11, %v2496_v17  ;;  %v1226_v44 = vmax.f32 %v1223_v18, %v1224_v12 }
 0x2bd   : > { %v1225_v46 = vmax.f32 %v1221_v37, %v1222_v43 }
 0x2bf   : > { %v1227_v47 = vmax.f32 %v1225_v46, %v1226_v44 }
 0x2c1   : > { %v1228_v48 = vrot.slane %v1227_v47, 4 }
 0x2c3   : > { %v1229_v49 = vmax.f32 %v1227_v47, %v1228_v48 }
 0x2c5   : > { %v1230_v51 = vrot.slane %v1229_v49, 2 }
 0x2c7   : > { %v1231_v52 = vmax.f32 %v1229_v49, %v1230_v51 }
 0x2c9   : > { %v1232_v53 = vrot.slane %v1231_v52, 1 }
 0x2cb   : > { %v2501_v54 = vmax.f32 %v1231_v52, %v1232_v53 }
 0x2cd   : > { %v1234_v55 = vsub.f32 %v2395_v20, %v2501_v54  ;;  %v1235_v56 = vsub.f32 %v2399_v23, %v2501_v54  ;;  %v1236_v58 = vsub.f32 %v2393_v19, %v2501_v54  ;;  %v1237_v59 = vsub.f32 %v2397_v21, %v2501_v54 }
 0x2ce   : > { %v1238_v60 = vsub.f32 %v2403_v14, %v2501_v54  ;;  %v1239_v0 = vsub.f32 %v2407_v25, %v2501_v54  ;;  %v1242_v20 = vsub.f32 %v2411_v27, %v2501_v54  ;;  %v1243_v23 = vsub.f32 %v2415_v29, %v2501_v54 }
 0x2cf   : > { %v1266_v61 = vmul.f32 1.442695, %v1234_v55  ;;  %v1268_v62 = vmul.f32 1.442695, %v1235_v56  ;;  %v1270_v1 = vmul.f32 1.442695, %v1236_v58  ;;  %v1240_v21 = vsub.f32 %v2401_v24, %v2501_v54 }
 0x2d0   : > { %v1272_v19 = vmul.f32 1.442695, %v1237_v59  ;;  %v1274_v2 = vmul.f32 1.442695, %v1238_v60  ;;  %v1276_v14 = vmul.f32 1.442695, %v1239_v0  ;;  %v1241_v25 = vsub.f32 %v2405_v16, %v2501_v54 }
 0x2d1   : > { %1961 = vpow2.f32 %v1266_v61  ;;  %v1282_v3 = vmul.f32 1.442695, %v1242_v20  ;;  %v1284_v5 = vmul.f32 1.442695, %v1243_v23  ;;  %v1244_v27 = vsub.f32 %v2409_v26, %v2501_v54 }
 0x2d2   : > { %1963 = vpow2.f32 %v1268_v62  ;;  %v1278_v29 = vmul.f32 1.442695, %v1240_v21  ;;  %v1250_v6 = vsub.f32 %v2427_v34, %v2501_v54  ;;  %v1251_v24 = vsub.f32 %v2431_v36, %v2501_v54 }
 0x2d3   : > { %1965 = vpow2.f32 %v1270_v1  ;;  %v1280_v7 = vmul.f32 1.442695, %v1241_v25  ;;  %v1252_v16 = vsub.f32 %v2425_v33, %v2501_v54  ;;  %v1253_v8 = vsub.f32 %v2429_v35, %v2501_v54 }
 0x2d4   : > { %1967 = vpow2.f32 %v1272_v19  ;;  %v1286_v9 = vmul.f32 1.442695, %v1244_v27  ;;  %v1298_v26 = vmul.f32 1.442695, %v1250_v6  ;;  %v1245_v34 = vsub.f32 %v2413_v28, %v2501_v54 }
 0x2d5   : > { %1969 = vpow2.f32 %v1274_v2  ;;  %v1300_v15 = vmul.f32 1.442695, %v1251_v24  ;;  %v1302_v36 = vmul.f32 1.442695, %v1252_v16  ;;  %v1246_v12 = vsub.f32 %v2419_v32, %v2501_v54 }
 0x2d6   : > { %1971 = vpow2.f32 %v1276_v14  ;;  %v1304_v33 = vmul.f32 1.442695, %v1253_v8  ;;  %v1247_v37 = vsub.f32 %v2423_v31, %v2501_v54  ;;  %v1288_v28 = vmul.f32 1.442695, %v1245_v34 }
 0x2d7   : > { %1973 = vpow2.f32 %v1282_v3  ;;  %v1248_v32 = vsub.f32 %v2417_v30, %v2501_v54  ;;  %v1249_v47 = vsub.f32 %v2421_v22, %v2501_v54  ;;  %v1290_v48 = vmul.f32 1.442695, %v1246_v12 }
 0x2d8   : > { %1975 = vpow2.f32 %v1284_v5  ;;  %v1262_v51 = vsub.f32 %v2481_v4, %v2501_v54  ;;  %v1263_v30 = vsub.f32 %v2496_v17, %v2501_v54  ;;  %v1292_v53 = vmul.f32 1.442695, %v1247_v37 }
 0x2d9   : > { %1977 = vpow2.f32 %v1278_v29  ;;  %v1264_v22 = vsub.f32 %v2475_v63, %v2501_v54  ;;  %v1265_v58 = vsub.f32 %v2490_v10, %v2501_v54  ;;  %v1294_v59 = vmul.f32 1.442695, %v1248_v32 }
 0x2da   : > { %1979 = vpow2.f32 %v1280_v7  ;;  %v1296_v4 = vmul.f32 1.442695, %v1249_v47  ;;  %v1322_v62 = vmul.f32 1.442695, %v1262_v51  ;;  %v1324_v0 = vmul.f32 1.442695, %v1263_v30 }
 0x2db   : > { %1981 = vpow2.f32 %v1286_v9  ;;  %v1260_v63 = vsub.f32 %v2441_v42, %v2501_v54  ;;  %v1326_v10 = vmul.f32 1.442695, %v1264_v22  ;;  %v1261_v23 = vsub.f32 %v2455_v50, %v2501_v54 }
 0x2dc   : > { %1983 = vpow2.f32 %v1298_v26  ;;  %v1328_v19 = vmul.f32 1.442695, %v1265_v58  ;;  %v1254_v3 = vsub.f32 %v2435_v39, %v2501_v54  ;;  %v1258_v50 = vsub.f32 %v2447_v45, %v2501_v54 }
 0x2dd   : > { %1985 = vpow2.f32 %v1300_v15  ;;  %v1259_v5 = vsub.f32 %v2466_v57, %v2501_v54  ;;  %v1318_v27 = vmul.f32 1.442695, %v1260_v63  ;;  %v1320_v6 = vmul.f32 1.442695, %v1261_v23 }
 0x2de   : > { %v2533_v13 = vpop.eup %1961  ;;  %1987 = vpow2.f32 %v1302_v36  ;;  %v1255_v16 = vsub.f32 %v2439_v41, %v2501_v54  ;;  %v1306_v45 = vmul.f32 1.442695, %v1254_v3  ;;  %v1256_v26 = vsub.f32 %v2433_v38, %v2501_v54 }
 0x2df   : > { %v2537_v11 = vpop.eup %1963  ;;  %1989 = vpow2.f32 %v1304_v33  ;;  %v1314_v34 = vmul.f32 1.442695, %v1258_v50  ;;  %v1257_v15 = vsub.f32 %v2437_v40, %v2501_v54  ;;  %v1316_v36 = vmul.f32 1.442695, %v1259_v5 }
 0x2e0   : > { %v1330_v35 = vadd.f32 %v2537_v11, %v2533_v13  ;;  %v2543_v18 = vpop.eup %1965  ;;  %1991 = vpow2.f32 %v1288_v28  ;;  %v1308_v41 = vmul.f32 1.442695, %v1255_v16  ;;  %v1310_v28 = vmul.f32 1.442695, %v1256_v26 }
 0x2e1   : > { %v2548_v44 = vpop.eup %1967  ;;  %1993 = vpow2.f32 %v1290_v48  ;;  %v1312_v32 = vmul.f32 1.442695, %v1257_v15 }
 0x2e2   : > { %v1331_v43 = vadd.f32 %v2543_v18, %v1330_v35  ;;  %v2552_v46 = vpop.eup %1969  ;;  %1995 = vpow2.f32 %v1292_v53 }
 0x2e3   : > { %v2557_v31 = vpop.eup %1971  ;;  %1997 = vpow2.f32 %v1294_v59 }
 0x2e4   : > { %v1332_v49 = vadd.f32 %v2548_v44, %v1331_v43  ;;  %v2561_v52 = vpop.eup %1973  ;;  %1999 = vpow2.f32 %v1296_v4  ;;  %v1369_v15 = vpack.c.bf16 %v2557_v31, %v2552_v46 }
 0x2e5   : > { %v2566_v56 = vpop.eup %1975  ;;  %2001 = vpow2.f32 %v1322_v62 }
 0x2e6   : > { %v1333_v55 = vadd.f32 %v2552_v46, %v1332_v49  ;;  %v1371_v17 = vpack.c.bf16 %v2566_v56, %v2561_v52  ;;  %v2575_v61 = vpop.eup %1977  ;;  %2003 = vpow2.f32 %v1324_v0  ;;  %v1367_v46 = vpack.c.bf16 %v2537_v11, %v2533_v13 }
 0x2e7   : > { %v2578_v20 = vpop.eup %1979  ;;  %2005 = vpow2.f32 %v1326_v10 }
 0x2e8   : > { %v1334_v60 = vadd.f32 %v2557_v31, %v1333_v55  ;;  %v2585_v21 = vpop.eup %1981  ;;  %2007 = vpow2.f32 %v1328_v19  ;;  %v1370_v26 = vpack.c.bf16 %v2578_v20, %v2575_v61 }
 0x2e9   : > { %v2587_v14 = vpop.eup %1983  ;;  %2009 = vpow2.f32 %v1318_v27 }
 0x2ea   : > { %v1335_v1 = vadd.f32 %v2575_v61, %v1334_v60  ;;  %v2592_v25 = vpop.eup %1985  ;;  %2011 = vpow2.f32 %v1320_v6  ;;  %v1955_v61 = vld [vmem:[#allocation2 + $0x40] ss:$8 sps:$4 sm:$0xff]  }
 0x2eb   : > { %v2598_v29 = vpop.eup %1987  ;;  %v1375_v39 = vpack.c.bf16 %v2592_v25, %v2587_v14  ;;  %2013 = vpow2.f32 %v1306_v45 }
 0x2ec   : > { %v1336_v2 = vadd.f32 %v2578_v20, %v1335_v1  ;;  %v2603_v7 = vpop.eup %1989  ;;  %2015 = vpow2.f32 %v1314_v34  ;;  %v1958_v20 = vld [vmem:[#allocation2 + $0x54] ss:$8 sps:$4 sm:$0xff]  }
 0x2ed   : > { %v1376_v57 = vpack.c.bf16 %v2603_v7, %v2598_v29  ;;  %v1992_v9 = vpop.eup %1991  ;;  %2017 = vpow2.f32 %v1316_v36 }
 0x2ee   : > { %v1337_v42 = vadd.f32 %v2561_v52, %v1336_v2  ;;  %v1994_v33 = vpop.eup %1993  ;;  %2019 = vpow2.f32 %v1308_v41  ;;  %v1368_v52 = vpack.c.bf16 %v2548_v44, %v2543_v18 }
 0x2ef   : > { %v1996_v37 = vpop.eup %1995  ;;  %2021 = vpow2.f32 %v1310_v28  ;;  %v1469_v28 = vpop.permute.xlu1 %1468 }
 0x2f0   : > { %v1338_v24 = vadd.f32 %v2566_v56, %v1337_v42  ;;  %v1998_v43 = vpop.eup %1997  ;;  %2023 = vpow2.f32 %v1312_v32  ;;  %v1373_v1 = vpack.c.bf16 %v1996_v37, %v1994_v33  ;;  %v1372_v42 = vpack.c.bf16 %v1992_v9, %v2585_v21 }
 0x2f1   : > { %v2000_v38 = vpop.eup %1999 }
 0x2f2   : > { %v1339_v8 = vadd.f32 %v2585_v21, %v1338_v24  ;;  %v2002_v48 = vpop.eup %2001  ;;  %v1374_v53 = vpack.c.bf16 %v2000_v38, %v1998_v43 }
 0x2f3   : > { %v2004_v51 = vpop.eup %2003 }
 0x2f4   : > { %v1340_v12 = vadd.f32 %v1992_v9, %v1339_v8  ;;  %v2006_v40 = vpop.eup %2005  ;;  %v1381_v4 = vpack.c.bf16 %v2004_v51, %v2002_v48 }
 0x2f5   : > { %v2008_v30 = vpop.eup %2007 }
 0x2f6   : > { %v1341_v35 = vadd.f32 %v1994_v33, %v1340_v12  ;;  %v1382_v22 = vpack.c.bf16 %v2008_v30, %v2006_v40  ;;  %v2010_v58 = vpop.eup %2009 }
 0x2f7   : > { %v2012_v60 = vpop.eup %2011 }
 0x2f8   : > { %v1342_v47 = vadd.f32 %v1996_v37, %v1341_v35  ;;  %1724 = vmatprep.subr.bf16.mxu1 %v1382_v22  ;;  %v2014_v0 = vpop.eup %2013  ;;  %v1380_v23 = vpack.c.bf16 %v2012_v60, %v2010_v58  ;;  %v1464_v35 = vpop.permute.xlu0 %1463 }
 0x2f9   : > { %1725 = vmatpush3.bf16.msra.mxu1 %v1374_v53  ;;  %v2016_v63 = vpop.eup %2015 }
 0x2fa   : > { %v1343_v49 = vadd.f32 %v1998_v43, %v1342_v47  ;;  %1726 = vmatprep.subr.bf16.mxu1 %v1381_v4  ;;  %v2018_v19 = vpop.eup %2017 }
 0x2fb   : > { %v2020_v3 = vpop.eup %2019  ;;  %v1379_v27 = vpack.c.bf16 %v2018_v19, %v2016_v63 }
 0x2fc   : > { %v1344_v54 = vadd.f32 %v2000_v38, %v1343_v49  ;;  %v2022_v50 = vpop.eup %2021  ;;  %v1377_v21 = vpack.c.bf16 %v2020_v3, %v2014_v0 }
 0x2fd   : > { %1727 = vmatpush3.bf16.msra.mxu1 %v1373_v1  ;;  %v2024_v6 = vpop.eup %2023 }
 0x2fe   : > { %v1345_v55 = vadd.f32 %v2587_v14, %v1344_v54  ;;  %1728 = vmatprep.subr.bf16.mxu1 %v1380_v23  ;;  %v1378_v45 = vpack.c.bf16 %v2024_v6, %v2022_v50  ;;  %v1474_v54 = vpop.permute.xlu1 %1473 }
 0x300   : > { %v1346_v59 = vadd.f32 %v2592_v25, %v1345_v55 }
 0x301   : > { %1729 = vmatpush3.bf16.msra.mxu1 %v1372_v42 }
 0x302   : > { %v1347_v62 = vadd.f32 %v2598_v29, %v1346_v59  ;;  %1730 = vmatprep.subr.bf16.mxu1 %v1379_v27  ;;  %v1960_v29 = vld [vmem:[#allocation2 + $0x50] ss:$8 sps:$4 sm:$0xff]   ;;  %v1479_v4 = vpop.permute.xlu1 %1478 }
 0x304   : > { %v1348_v10 = vadd.f32 %v2603_v7, %v1347_v62 }
 0x305   : > { %1731 = vmatpush3.bf16.msra.mxu1 %v1371_v17 }
 0x306   : > { %v1349_v2 = vadd.f32 %v2014_v0, %v1348_v10  ;;  %1732 = vmatprep.subr.bf16.mxu1 %v1378_v45 }
 0x308   : > { %v1350_v5 = vadd.f32 %v2020_v3, %v1349_v2 }
 0x309   : > { %1733 = vmatpush3.bf16.msra.mxu1 %v1370_v26 }
 0x30a   : > { %v1351_v24 = vadd.f32 %v2022_v50, %v1350_v5  ;;  %1734 = vmatprep.subr.bf16.mxu1 %v1377_v21 }
 0x30c   : > { %v1352_v16 = vadd.f32 %v2024_v6, %v1351_v24 }
 0x30d   : > { %1735 = vmatpush3.bf16.msra.mxu1 %v1369_v15 }
 0x30e   : > { %v1353_v8 = vadd.f32 %v2016_v63, %v1352_v16  ;;  %1736 = vmatprep.subr.bf16.mxu1 %v1376_v57 }
 0x310   : > { %v1354_v34 = vadd.f32 %v2018_v19, %v1353_v8 }
 0x311   : > { %1737 = vmatpush3.bf16.msra.mxu1 %v1368_v52 }
 0x312   : > { %v1355_v9 = vadd.f32 %v2010_v58, %v1354_v34  ;;  %1738 = vmatprep.subr.bf16.mxu1 %v1375_v39 }
 0x314   : > { %v1356_v36 = vadd.f32 %v2012_v60, %v1355_v9 }
 0x315   : > { %1739 = vmatpush3.bf16.msra.mxu1 %v1367_v46 }
 0x316   : > { %v1357_v12 = vadd.f32 %v2002_v48, %v1356_v36 }
 0x318   : > { %v1358_v56 = vadd.f32 %v2004_v51, %v1357_v12  ;;  %1436 = vmatmul.mubr.bf16.vlgmr.msra.gmra.mxu1 %v1955_v61 }
 0x319   : > { %1443 = vmatprep.mubr.bf16.mxu1 %v1958_v20 }
 0x31a   : > { %v1359_v17 = vadd.f32 %v2006_v40, %v1358_v56 }
 0x31c   : > { %v1360_v31 = vadd.f32 %v2008_v30, %v1359_v17 }
 0x31e   : > { %v1361_v7 = vrot.slane %v1360_v31, 4 }
 0x320   : > { %1444 = vmatmul.mubr.bf16.gmra.mxu1 %v1960_v29  ;;  %v1362_v18 = vadd.f32 %v1361_v7, %v1360_v31 }
 0x322   : > { %v1363_v44 = vrot.slane %v1362_v18, 2 }
 0x324   : > { %v1364_v57 = vadd.f32 %v1363_v44, %v1362_v18 }
 0x326   : > { %v1365_v33 = vrot.slane %v1364_v57, 1 }
 0x328   : > { %v1366_v14 = vadd.f32 %v1365_v33, %v1364_v57 }
 0x32a   : > { %2025 = vrcp.f32 %v1366_v14 }
 0x337   : > { %v2026_v11 = vpop.eup %2025 }
 0x3d8   : > { %v1740_v25 = vpop.f32.mrf.mxu1 }
 0x3da   : > { %v1741_v39 = vpop.f32.mrf.mxu1 }
 0x3db   : > { %v1742_v13 = vadd.f32 %v1741_v39, %v1740_v25 }
 0x3dc   : > { %v1743_v41 = vpop.f32.mrf.mxu1 }
 0x3dd   : > { %v1453_v37 = vmul.f32 %v2026_v11, %v1742_v13 }
 0x3de   : > { %v1744_v43 = vpop.f32.mrf.mxu1 }
 0x3df   : > { %v1481_v32 = vadd.f32 %v1464_v35, %v1453_v37  ;;  %v1745_v47 = vadd.f32 %v1744_v43, %v1743_v41 }
 0x3e0   : > { %v1746_v38 = vpop.f32.mrf.mxu1 }
 0x3e1   : > { %1485 = vst [vmem:[%s2233_s23] sm:$0xff] %v1481_v32  ;;  %v1454_v48 = vmul.f32 %v2026_v11, %v1745_v47 }
 0x3e2   : > { %v1747_v49 = vpop.f32.mrf.mxu1 }
 0x3e3   : > { %v1482_v51 = vadd.f32 %v1469_v28, %v1454_v48  ;;  %v1748_v40 = vadd.f32 %v1747_v49, %v1746_v38 }
 0x3e4   : > { %v1749_v30 = vpop.f32.mrf.mxu1 }
 0x3e5   : > { %1486 = vst [vmem:[%s2233_s23 + $0x8] sm:$0xff] %v1482_v51  ;;  %v1455_v53 = vmul.f32 %v2026_v11, %v1748_v40 }
 0x3e6   : > { %v1750_v55 = vpop.f32.mrf.mxu1 }
 0x3e7   : > { %v1483_v22 = vadd.f32 %v1474_v54, %v1455_v53  ;;  %v1751_v58 = vadd.f32 %v1750_v55, %v1749_v30 }
 0x3e9   : > { %1487 = vst [vmem:[%s2233_s23 + $0x10] sm:$0xff] %v1483_v22  ;;  %v1456_v59 = vmul.f32 %v2026_v11, %v1751_v58 }
 0x3eb   : > { %v1484_v60 = vadd.f32 %v1479_v4, %v1456_v59 }
 0x3ed   : > { %1488 = vst [vmem:[%s2233_s23 + $0x18] sm:$0xff] %v1484_v60 }
 0x3ee   : > { %2040 = shalt.err (!%p2037_p7)
}
 0x3ef   : > { %s2041_s8 = scalar_lea.hbm %s2645_s5, 512  ;;  %s2045_s13 = scalar_lea.hbm %s2707_s4, 2048 }
 0x3f0   : > { %p2042_p9 = scmp.ne.s32.totalorder %s2645_s5, %s2041_s8  ;;  %p2046_p12 = scmp.lt.s32.totalorder %s2645_s5, %s2707_s4 }
 0x3f1   : > { %p2047_p13 = scmp.lt.s32.totalorder %s2045_s13, %s2041_s8 }
 0x3f2   : > { %p2043_p10 = pnand %p2042_p9, %p2203_p3 }
 0x3f3   : > { %p2048_p0 = por %p2047_p13, %p2046_p12 }
 0x3f4   : > { %p2044_p11 = pneg %p2043_p10 }
 0x3f6   : > { %p2049_p1 = pnand %p2048_p0, %p2044_p11 }
 0x3f8   : > { %2052 = shalt.err (!%p2049_p1)
}
 0x3f9   : > { %s2124_s19 = smov 128   ;;  %s2125_s30 = smov 256  }
 0x3fa   : > { %s2126_s6 = smov 8  }
 0x3fb   : > { %1789 = dma.vmem_to_hbm [thread:$0]  (%p2203_p3), %s2647_s14, 512, %s2645_s5, %s2652_s18, %s2124_s19, %s2125_s30, %s2126_s6  }
 0x3fc PF: > { %p1795_p2 = scmp.ge.s32.totalorder %s2119_s22, 2  ;;  %s1519_s9 = sand.u32 1, %s2091_s15  }
 0x3fd   : > { %s1520_s10 = scalar_lea.sflag [#allocation4], %s1519_s9 }
 0x3fe   : > { %p1792_p4 = pnand %p1795_p2, %p2212_p8 }
 0x400   : > { %p1793_p5 = pneg %p1792_p4 }
 0x402   : > { %2086 = dma.done.wait (%p1793_p5), %s1520_s10, 512  }
 0x403   : > { %2088 = vsyncadd (%p1793_p5), %s1520_s10, 4294966784  ;;  %s17_s22 = sadd.s32 1, %s2119_s22   ;;  %s2710_s15 = smov %s2095_s16 }
 0x404   : > { %p14_p6 = scmp.ge.s32.totalorder %s17_s22, 6   ;;  %s2711_s16 = smov %s2099_s17 }
 0x405   : > { %s2712_s17 = smov %s2221_s7  ;;  %s2713_s18 = smov %s2111_s20 }
 0x406   : > { %s2714_s19 = smov %s2115_s21  ;;  %s2715_s20 = smov %s2718_s25 }
 0x407   : > { %s2716_s21 = smov %s2722_s26  ;;  %16 = sbr.rel (!%p14_p6) target bundleno = 5 (0x5), region = 76 }
 0x40c   :  { %1525 = vsyncpa [#allocation4], 1 }
 0x40d   :  { %1527 = vsyncpa [#allocation4 + $0x1], 1 }

</bundles_post_ra>
